<compile_context>
chip_gen: v7x
topology: tpu7x:2x2x1
jax: 0.10.0
libtpu: 0.0.40
codegen_flags: <defaults>
</compile_context>

<pallas_src>
import functools

import jax
import jax.numpy as jnp
from jax import lax
from jax.experimental import pallas as pl
from jax.experimental.pallas import tpu as pltpu


# ---------------------------------------------------------------------------
# Kernel: one image (one grid step) per invocation.
# ---------------------------------------------------------------------------
def basic_block_kernel(x_ref, w1_ref, w2_ref, sh_ref, o_ref, *, H, W, Cin, Cout):
    """Fused BasicBlock forward for one image.

    x_ref:  (H, W*Cin)             input rows, NHWC flattened over (W, C), f32
    w1_ref: (3*W*Cin, 2*W*Cout)    bf16; cols [0, WCout)  = K-stacked conv1
                                   row-tap Toeplitz mats (BN1 scale folded);
                                   cols [WCout, 2*WCout) = 1x1 shortcut
                                   block-diag in the center-tap K rows
                                   (BN_sc scale folded)
    w2_ref: (3*W*Cout, W*Cout)     bf16; K-stacked conv2 Toeplitz (BN2 folded)
    sh_ref: (2, 2*W*Cout)          f32; row0 = [BN1 shift | BN_sc shift],
                                   row1 = [BN2 shift | 0], tiled over W
    o_ref:  (H, W*Cout)            lane-dense output block, f32
    """
    WCout = W * Cout

    x = x_ref[...]                                            # (H, WCin) f32

    # Boundary-row masks (zero padding along H; also kills the roll wrap).
    row = lax.broadcasted_iota(jnp.int32, (H, 1), 0)
    top = row == 0
    bot = row == H - 1

    # --- conv1 + 1x1 shortcut: one matmul --------------------------------
    # Row taps via XLU sublane rotation; ky=0 needs input row y-1, ky=2 y+1.
    x_dn = jnp.where(top, 0.0, pltpu.roll(x, 1, axis=0))      # row y-1
    x_up = jnp.where(bot, 0.0, pltpu.roll(x, H - 1, axis=0))  # row y+1
    a1 = jnp.concatenate([x_dn, x, x_up], axis=1).astype(jnp.bfloat16)

    y1 = jnp.dot(a1, w1_ref[...], preferred_element_type=jnp.float32)
    y1 = y1 + sh_ref[0:1, :]                                  # BN1 & BN_sc shifts
    h = jnp.maximum(y1[:, :WCout], 0.0)                       # (H, WCout) f32
    sc = y1[:, WCout:]                                        # shortcut branch

    # --- conv2: one matmul (h never leaves the chip) ----------------------
    h_dn = jnp.where(top, 0.0, pltpu.roll(h, 1, axis=0))
    h_up = jnp.where(bot, 0.0, pltpu.roll(h, H - 1, axis=0))
    a2 = jnp.concatenate([h_dn, h, h_up], axis=1).astype(jnp.bfloat16)

    main = jnp.dot(a2, w2_ref[...], preferred_element_type=jnp.float32)
    main = main + sh_ref[1:2, :WCout]                         # BN2 shift

    # --- residual add + ReLU, full-128-lane store --------------------------
    o_ref[...] = jnp.maximum(main + sc, 0.0).astype(o_ref.dtype)


# ---------------------------------------------------------------------------
# Host-side weight preparation (hoisted: run ONCE per parameter set)
# ---------------------------------------------------------------------------
def _fold_bn(gamma, beta, mean, var, eps=1e-5):
    scale = gamma / jnp.sqrt(var + eps)
    shift = beta - mean * scale
    return scale.astype(jnp.float32), shift.astype(jnp.float32)


def _toeplitz_conv3x3(w_hwio, scale, W):
    """Fold BN scale into a 3x3 conv weight and build, per row tap ky, the
    (W*Cin, W*Cout) block-Toeplitz matrix applying the width taps and the
    implicit x-direction zero padding as a single matmul."""
    kh, kw, Cin, Cout = w_hwio.shape
    wf = (w_hwio * scale.reshape(1, 1, 1, Cout)).astype(jnp.float32)
    xin = jnp.arange(W)
    xout = jnp.arange(W)
    kx = jnp.arange(kw)
    # sel[xin, xout, kx] = 1  iff  xin == xout + kx - 1   (padding = 1)
    sel = (xin[:, None, None] == xout[None, :, None] + kx[None, None, :] - 1)
    sel = sel.astype(jnp.float32)
    m = jnp.einsum('iok,ykcd->yicod', sel, wf)          # (kh, W, Cin, W, Cout)
    return m.reshape(kh, W * Cin, W * Cout)


def _blockdiag_conv1x1(w_io, scale, W):
    """Fold BN scale into the 1x1 shortcut weight and lift it to a
    (W*Cin, W*Cout) block-diagonal matrix acting on the flat (W*C) lane axis."""
    Cin, Cout = w_io.shape
    wf = (w_io * scale.reshape(1, Cout)).astype(jnp.float32)
    eye = jnp.eye(W, dtype=jnp.float32)
    return jnp.einsum('io,cd->icod', eye, wf).reshape(W * Cin, W * Cout)


def prepare_block_params(params, *, W):
    """Precompute kernel weight operands (bf16) and BN shifts (f32)."""
    _, _, Cin, Cout = params["w1"].shape
    WCin, WCout = W * Cin, W * Cout

    s1, b1 = _fold_bn(*params["bn1"])
    s2, b2 = _fold_bn(*params["bn2"])
    ss, bs = _fold_bn(*params["bn_sc"])

    t1 = _toeplitz_conv3x3(params["w1"], s1, W)           # (3, WCin, WCout)
    t2 = _toeplitz_conv3x3(params["w2"], s2, W)           # (3, WCout, WCout)
    blk = _blockdiag_conv1x1(params["w_sc"], ss, W)       # (WCin, WCout)

    # conv1 weight K-stacked over the 3 row taps, with the 1x1 shortcut fused
    # into 128 extra output lanes (only the center-tap K rows are nonzero).
    w1_main = t1.reshape(3 * WCin, WCout)
    zeros = jnp.zeros((WCin, WCout), jnp.float32)
    w1_sc = jnp.concatenate([zeros, blk, zeros], axis=0)
    w1m = jnp.concatenate([w1_main, w1_sc], axis=1).astype(jnp.bfloat16)
    # conv2 weight K-stacked over the 3 row taps.
    w2m = t2.reshape(3 * WCout, WCout).astype(jnp.bfloat16)

    shifts = jnp.stack([
        jnp.concatenate([jnp.tile(b1, W), jnp.tile(bs, W)]),
        jnp.concatenate([jnp.tile(b2, W), jnp.zeros((WCout,), jnp.float32)]),
    ])                                                     # (2, 2*WCout) f32
    return {"w1m": w1m, "w2m": w2m, "shifts": shifts}


# ---------------------------------------------------------------------------
# Wrapper (jit this; input/output are NCHW for PyTorch parity)
# ---------------------------------------------------------------------------
def basic_block_forward(x_nchw, prepped):
    x = jnp.transpose(x_nchw, (0, 2, 3, 1)).astype(jnp.float32)   # -> NHWC
    N, H, W, Cin = x.shape
    WCin = W * Cin
    w1m, w2m, shifts = prepped["w1m"], prepped["w2m"], prepped["shifts"]
    WCout = w1m.shape[1] // 2
    Cout = WCout // W

    x_flat = x.reshape(N, H, WCin)

    out_flat = pl.pallas_call(
        functools.partial(basic_block_kernel, H=H, W=W, Cin=Cin, Cout=Cout),
        out_shape=jax.ShapeDtypeStruct((N, H, WCout), jnp.float32),
        grid=(N,),
        in_specs=[
            pl.BlockSpec((None, H, WCin), lambda n: (n, 0, 0)),
            pl.BlockSpec(w1m.shape, lambda n: (0, 0)),
            pl.BlockSpec(w2m.shape, lambda n: (0, 0)),
            pl.BlockSpec(shifts.shape, lambda n: (0, 0)),
        ],
        out_specs=pl.BlockSpec((None, H, WCout), lambda n: (n, 0, 0)),
        compiler_params=pltpu.CompilerParams(
            dimension_semantics=("parallel",)),
    )(x_flat, w1m, w2m, shifts)

    out = out_flat.reshape(N, H, W, Cout)
    return jnp.transpose(out, (0, 3, 1, 2))                       # -> NCHW


# ---------------------------------------------------------------------------
# Pure-JAX f32 reference (for correctness check)
# ---------------------------------------------------------------------------
def reference_forward(x_nchw, params):
    x = jnp.transpose(x_nchw, (0, 2, 3, 1)).astype(jnp.float32)
    dn = ("NHWC", "HWIO", "NHWC")

    def conv(inp, w, pad):
        return lax.conv_general_dilated(inp, w, (1, 1), pad,
                                        dimension_numbers=dn)

    s1, b1 = _fold_bn(*params["bn1"])
    s2, b2 = _fold_bn(*params["bn2"])
    ss, bs = _fold_bn(*params["bn_sc"])

    h = jnp.maximum(conv(x, params["w1"], ((1, 1), (1, 1))) * s1 + b1, 0.0)
    main = conv(h, params["w2"], ((1, 1), (1, 1))) * s2 + b2
    sc = conv(x, params["w_sc"].reshape(1, 1, *params["w_sc"].shape),
              ((0, 0), (0, 0))) * ss + bs
    out = jnp.maximum(main + sc, 0.0)
    return jnp.transpose(out, (0, 3, 1, 2))


# ---------------------------------------------------------------------------
# Main
# ---------------------------------------------------------------------------
if __name__ == "__main__":
    key = jax.random.PRNGKey(0)
    N, Cin, Cout, H, W = 2, 4, 8, 16, 16

    ks = jax.random.split(key, 12)
    params = {
        # conv weights in HWIO layout (conv3x3: bias=False because BN is on)
        "w1": jax.random.normal(ks[0], (3, 3, Cin, Cout), jnp.float32) * 0.1,
        "w2": jax.random.normal(ks[1], (3, 3, Cout, Cout), jnp.float32) * 0.1,
        "w_sc": jax.random.normal(ks[2], (Cin, Cout), jnp.float32) * 0.1,
        # BN params: (gamma, beta, running_mean, running_var)
        "bn1": (jax.random.normal(ks[3], (Cout,)) * 0.1 + 1.0,
                jax.random.normal(ks[4], (Cout,)) * 0.1,
                jax.random.normal(ks[5], (Cout,)) * 0.1,
                jax.random.uniform(ks[6], (Cout,), minval=0.5, maxval=1.5)),
        "bn2": (jax.random.normal(ks[7], (Cout,)) * 0.1 + 1.0,
                jax.random.normal(ks[8], (Cout,)) * 0.1,
                jax.random.normal(ks[9], (Cout,)) * 0.1,
                jax.random.uniform(ks[10], (Cout,), minval=0.5, maxval=1.5)),
        "bn_sc": (jnp.ones((Cout,)), jnp.zeros((Cout,)),
                  jnp.zeros((Cout,)), jnp.ones((Cout,))),
    }

    x = jax.random.normal(ks[11], (N, Cin, H, W), jnp.float32)

    # Weight prep runs once per parameter set (outside the per-call path).
    prepped = jax.block_until_ready(prepare_block_params(params, W=W))

    fwd = jax.jit(basic_block_forward)
    out = jax.block_until_ready(fwd(x, prepped))
    ref = jax.block_until_ready(reference_forward(x, params))

    assert out.shape == (N, Cout, H, W), out.shape
    # bf16 MXU operands vs f32 reference -> loosened tolerance.
    err = float(jnp.max(jnp.abs(out - ref)))
    assert jnp.allclose(out, ref, atol=5e-2, rtol=5e-2), err

    print("KERNEL_OK")
</pallas_src>

<mosaic_0001>
module attributes {stable_mosaic.version = 11 : i64} {
  func.func @basic_block_kernel(%arg0: i32, %arg1: memref<1x16x64xf32, #tpu.memory_space<vmem>>, %arg2: memref<192x256xbf16, #tpu.memory_space<vmem>>, %arg3: memref<384x128xbf16, #tpu.memory_space<vmem>>, %arg4: memref<2x256xf32, #tpu.memory_space<vmem>>, %arg5: memref<1x16x128xf32, #tpu.memory_space<vmem>>) attributes {dimension_semantics = [#tpu.dimension_semantics<parallel>], iteration_bounds = array<i64: 2>, scalar_prefetch = 0 : i64, scratch_operands = 0 : i64, tpu.core_type = #tpu.core_type<tc>, window_params = [{transform_indices = @transform_0, window_bounds = array<i64: 1, 16, 64>}, {pipeline_mode = #tpu.pipeline_mode<synchronous>, transform_indices = @transform_1, window_bounds = array<i64: 192, 256>}, {pipeline_mode = #tpu.pipeline_mode<synchronous>, transform_indices = @transform_2, window_bounds = array<i64: 384, 128>}, {pipeline_mode = #tpu.pipeline_mode<synchronous>, transform_indices = @transform_3, window_bounds = array<i64: 2, 256>}, {transform_indices = @transform_4, window_bounds = array<i64: 1, 16, 128>}]} {
    %c0 = arith.constant 0 : index
    %c0_0 = arith.constant 0 : index
    %c0_1 = arith.constant 0 : index
    %0 = vector.load %arg1[%c0, %c0_0, %c0_1] : memref<1x16x64xf32, #tpu.memory_space<vmem>>, vector<1x16x64xf32>
    %1 = vector.shape_cast %0 : vector<1x16x64xf32> to vector<16x64xf32>
    %2 = tpu.iota {dimensions = array<i32: 0>} : vector<16x1xi32>
    %c0_i32 = arith.constant 0 : i32
    %3 = vector.broadcast %c0_i32 : i32 to vector<16x1xi32>
    %4 = arith.cmpi eq, %2, %3 : vector<16x1xi32>
    %c15_i32 = arith.constant 15 : i32
    %5 = vector.broadcast %c15_i32 : i32 to vector<16x1xi32>
    %6 = arith.cmpi eq, %2, %5 : vector<16x1xi32>
    %c1_i32 = arith.constant 1 : i32
    %7 = tpu.dynamic_rotate %1 by %c1_i32 dim 0 : vector<16x64xf32>, i32 -> vector<16x64xf32>
    %cst = arith.constant 0.000000e+00 : f32
    %8 = vector.shape_cast %4 : vector<16x1xi1> to vector<16x1xi1>
    %9 = vector.broadcast %8 : vector<16x1xi1> to vector<16x64xi1>
    %10 = vector.broadcast %cst : f32 to vector<16x64xf32>
    %11 = arith.select %9, %10, %7 : vector<16x64xi1>, vector<16x64xf32>
    %c15_i32_2 = arith.constant 15 : i32
    %12 = tpu.dynamic_rotate %1 by %c15_i32_2 dim 0 : vector<16x64xf32>, i32 -> vector<16x64xf32>
    %cst_3 = arith.constant 0.000000e+00 : f32
    %13 = vector.shape_cast %6 : vector<16x1xi1> to vector<16x1xi1>
    %14 = vector.broadcast %13 : vector<16x1xi1> to vector<16x64xi1>
    %15 = vector.broadcast %cst_3 : f32 to vector<16x64xf32>
    %16 = arith.select %14, %15, %12 : vector<16x64xi1>, vector<16x64xf32>
    %17 = tpu.concatenate %11, %1, %16 in 1 : vector<16x64xf32>, vector<16x64xf32>, vector<16x64xf32> -> vector<16x192xf32>
    %18 = arith.truncf %17 : vector<16x192xf32> to vector<16x192xbf16>
    %c0_4 = arith.constant 0 : index
    %c0_5 = arith.constant 0 : index
    %19 = vector.load %arg2[%c0_4, %c0_5] : memref<192x256xbf16, #tpu.memory_space<vmem>>, vector<192x256xbf16>
    %cst_6 = arith.constant dense<0.000000e+00> : vector<16x256xf32>
    %20 = tpu.matmul %18, %19, %cst_6 {dimension_numbers = #tpu.dot_dimension_numbers<[1], [0], [0], [1], [0, 0, 1, 1], [], []>} : vector<16x192xbf16>, vector<192x256xbf16>, vector<16x256xf32> -> vector<16x256xf32>
    %c0_7 = arith.constant 0 : index
    %c0_8 = arith.constant 0 : index
    %21 = vector.load %arg4[%c0_7, %c0_8] : memref<2x256xf32, #tpu.memory_space<vmem>>, vector<1x256xf32>
    %22 = vector.broadcast %21 : vector<1x256xf32> to vector<16x256xf32>
    %23 = arith.addf %20, %22 : vector<16x256xf32>
    %24 = vector.extract_strided_slice %23 {offsets = [0, 0], sizes = [16, 128], strides = [1, 1]} : vector<16x256xf32> to vector<16x128xf32>
    %cst_9 = arith.constant 0.000000e+00 : f32
    %25 = vector.broadcast %cst_9 : f32 to vector<16x128xf32>
    %26 = arith.maximumf %24, %25 : vector<16x128xf32>
    %27 = vector.extract_strided_slice %23 {offsets = [0, 128], sizes = [16, 128], strides = [1, 1]} : vector<16x256xf32> to vector<16x128xf32>
    %c1_i32_10 = arith.constant 1 : i32
    %28 = tpu.dynamic_rotate %26 by %c1_i32_10 dim 0 : vector<16x128xf32>, i32 -> vector<16x128xf32>
    %cst_11 = arith.constant 0.000000e+00 : f32
    %29 = vector.shape_cast %4 : vector<16x1xi1> to vector<16x1xi1>
    %30 = vector.broadcast %29 : vector<16x1xi1> to vector<16x128xi1>
    %31 = vector.broadcast %cst_11 : f32 to vector<16x128xf32>
    %32 = arith.select %30, %31, %28 : vector<16x128xi1>, vector<16x128xf32>
    %c15_i32_12 = arith.constant 15 : i32
    %33 = tpu.dynamic_rotate %26 by %c15_i32_12 dim 0 : vector<16x128xf32>, i32 -> vector<16x128xf32>
    %cst_13 = arith.constant 0.000000e+00 : f32
    %34 = vector.shape_cast %6 : vector<16x1xi1> to vector<16x1xi1>
    %35 = vector.broadcast %34 : vector<16x1xi1> to vector<16x128xi1>
    %36 = vector.broadcast %cst_13 : f32 to vector<16x128xf32>
    %37 = arith.select %35, %36, %33 : vector<16x128xi1>, vector<16x128xf32>
    %38 = tpu.concatenate %32, %26, %37 in 1 : vector<16x128xf32>, vector<16x128xf32>, vector<16x128xf32> -> vector<16x384xf32>
    %39 = arith.truncf %38 : vector<16x384xf32> to vector<16x384xbf16>
    %c0_14 = arith.constant 0 : index
    %c0_15 = arith.constant 0 : index
    %40 = vector.load %arg3[%c0_14, %c0_15] : memref<384x128xbf16, #tpu.memory_space<vmem>>, vector<384x128xbf16>
    %cst_16 = arith.constant dense<0.000000e+00> : vector<16x128xf32>
    %41 = tpu.matmul %39, %40, %cst_16 {dimension_numbers = #tpu.dot_dimension_numbers<[1], [0], [0], [1], [0, 0, 1, 1], [], []>} : vector<16x384xbf16>, vector<384x128xbf16>, vector<16x128xf32> -> vector<16x128xf32>
    %c1 = arith.constant 1 : index
    %c0_17 = arith.constant 0 : index
    %42 = vector.load %arg4[%c1, %c0_17] : memref<2x256xf32, #tpu.memory_space<vmem>>, vector<1x128xf32>
    %43 = vector.broadcast %42 : vector<1x128xf32> to vector<16x128xf32>
    %44 = arith.addf %41, %43 : vector<16x128xf32>
    %45 = arith.addf %44, %27 : vector<16x128xf32>
    %cst_18 = arith.constant 0.000000e+00 : f32
    %46 = vector.broadcast %cst_18 : f32 to vector<16x128xf32>
    %47 = arith.maximumf %45, %46 : vector<16x128xf32>
    %c0_19 = arith.constant 0 : index
    %c0_20 = arith.constant 0 : index
    %c0_21 = arith.constant 0 : index
    %48 = vector.load %arg5[%c0_19, %c0_20, %c0_21] : memref<1x16x128xf32, #tpu.memory_space<vmem>>, vector<1x16x128xf32>
    %49 = vector.shape_cast %48 : vector<1x16x128xf32> to vector<16x128xf32>
    %50 = vector.shape_cast %47 : vector<16x128xf32> to vector<1x16x128xf32>
    tpu.vector_store %arg5[%c0_19, %c0_20, %c0_21], %50 {strides = array<i32>} : memref<1x16x128xf32, #tpu.memory_space<vmem>>, vector<1x16x128xf32>,
    return
  }
  func.func @transform_0(%arg0: i32) -> (i32, i32, i32) {
    %c0_i32 = arith.constant 0 : i32
    %c0_i32_0 = arith.constant 0 : i32
    %c0_i32_1 = arith.constant 0 : i32
    return %arg0, %c0_i32, %c0_i32_0 : i32, i32, i32
  }
  func.func @transform_1(%arg0: i32) -> (i32, i32) {
    %c0_i32 = arith.constant 0 : i32
    %c0_i32_0 = arith.constant 0 : i32
    %c0_i32_1 = arith.constant 0 : i32
    return %c0_i32, %c0_i32_0 : i32, i32
  }
  func.func @transform_2(%arg0: i32) -> (i32, i32) {
    %c0_i32 = arith.constant 0 : i32
    %c0_i32_0 = arith.constant 0 : i32
    %c0_i32_1 = arith.constant 0 : i32
    return %c0_i32, %c0_i32_0 : i32, i32
  }
  func.func @transform_3(%arg0: i32) -> (i32, i32) {
    %c0_i32 = arith.constant 0 : i32
    %c0_i32_0 = arith.constant 0 : i32
    %c0_i32_1 = arith.constant 0 : i32
    return %c0_i32, %c0_i32_0 : i32, i32
  }
  func.func @transform_4(%arg0: i32) -> (i32, i32, i32) {
    %c0_i32 = arith.constant 0 : i32
    %c0_i32_0 = arith.constant 0 : i32
    %c0_i32_1 = arith.constant 0 : i32
    return %arg0, %c0_i32, %c0_i32_0 : i32, i32, i32
  }
}

</mosaic_0001>

<bundles_post_ra>
// kernel: basic_block_forward.1
= control target key start
LH: loop header
LB: loop body
LE: loop exit
PB: predicated region body
PF: predicated region fallthrough
CT: control target
= control target key end

     0   :  { %s1038_s15 = smov 0   ;;  %s1258_s0 = inlined_call_operand.vmem [shape: f32[2,16,64], index: 0, kind: input, shape index: {}]   ;;  %s1259_s1 = inlined_call_operand.vmem [shape: bf16[192,256], index: 1, kind: input, shape index: {}]   ;;  %s1260_s2 = inlined_call_operand.vmem [shape: bf16[384,128], index: 2, kind: input, shape index: {}]   ;;  %s1261_s3 = inlined_call_operand.vmem [shape: f32[2,256], index: 3, kind: input, shape index: {}]   ;;  %s1262_s4 = inlined_call_operand.vmem [shape: f32[2,16,128], index: 4, kind: output, shape index: {}]  }
   0x1 LB: > { %s802_s16 = sadd.s32 4294967295, %s1007_s15   ;;  %p806_p0 = scmp.ge.s32.totalorder %s1007_s15, 1  ;;  %s1007_s15 = sphi %s1038_s15, %s14_s15  }
   0x2   : > { %p162_p1 = scmp.lt.s32.totalorder %s1007_s15, 3 }
   0x4   : > { %p163_p2 = pnand %p806_p0, %p162_p1 }
   0x5   : > { %p188_p3 = scmp.lt.s32.totalorder (!%p163_p2), %s802_s16, 1  ;;  %v941_v0 = vld [vmem:[%s1259_s1 + $0x4] ss:$8 sps:$4 sm:$0xff] (!%p163_p2)   ;;  %v201_v1 = vlaneseq (!%p163_p2)  ;;  %v943_v2 = vld [vmem:[%s1259_s1] ss:$8 sps:$4 sm:$0xff] (!%p163_p2)   ;;  %s1009_s9 = smov (!%p163_p2), 64  }
   0x6   : > { %166 = sbr.rel (%p163_p2) target bundleno = 615 (0x267), region = 36  ;;  %402 = vmatprep.subr.bf16.mxu0 (!%p163_p2), %v941_v0  ;;  %v944_v3 = vld [vmem:[%s1259_s1 + $0x14] ss:$8 sps:$4 sm:$0xff] (!%p163_p2)   ;;  %v946_v4 = vld [vmem:[%s1259_s1 + $0x10] ss:$8 sps:$4 sm:$0xff] (!%p163_p2)   ;;  %vm238_vm3 = vcmask (!%p163_p2), 523264  }
   0x7   : > { %403 = vmatpush1.bf16.msra.mxu0 (!%p163_p2), %v943_v2  ;;  %v1060_v5 = vshrl.u32 (!%p163_p2), %v201_v1, 7  ;;  %v947_v6 = vld [vmem:[%s1259_s1 + $0x24] ss:$8 sps:$4 sm:$0xff] (!%p163_p2)   ;;  %v949_v14 = vld [vmem:[%s1259_s1 + $0x20] ss:$8 sps:$4 sm:$0xff] (!%p163_p2)   ;;  %v981_v33 = vld [vmem:[%s1260_s2 + $0x50] sm:$0xff] (!%p163_p2)  }
   0x8   : > { %404 = vmatprep.subr.bf16.mxu0 (!%p163_p2), %v944_v3  ;;  %v950_v16 = vld [vmem:[%s1259_s1 + $0x34] ss:$8 sps:$4 sm:$0xff] (!%p163_p2)   ;;  %v952_v21 = vld [vmem:[%s1259_s1 + $0x30] ss:$8 sps:$4 sm:$0xff] (!%p163_p2)   ;;  %v953_v23 = vld [vmem:[%s1259_s1 + $0x44] ss:$8 sps:$4 sm:$0xff] (!%p163_p2)  }
   0x9   : > { %v1072_v7 = vadd.s32 (!%p163_p2), 8, %v1060_v5  ;;  %vm210_vm0 = vcmp.lt.s32.totalorder (!%p163_p2), %v1060_v5, 1  ;;  %vm221_vm1 = vcmp.lt.s32.totalorder (!%p163_p2), %v1060_v5, 7  ;;  %v955_v25 = vld [vmem:[%s1259_s1 + $0x40] ss:$8 sps:$4 sm:$0xff] (!%p163_p2)   ;;  %v982_v37 = vld [vmem:[%s1260_s2 + $0x10] sm:$0xff] (!%p163_p2)  }
   0xa   : > { %v956_v26 = vld [vmem:[%s1259_s1 + $0x54] ss:$8 sps:$4 sm:$0xff] (!%p163_p2)   ;;  %v958_v27 = vld [vmem:[%s1259_s1 + $0x50] ss:$8 sps:$4 sm:$0xff] (!%p163_p2)   ;;  %v959_v28 = vld [vmem:[%s1259_s1 + $0x64] ss:$8 sps:$4 sm:$0xff] (!%p163_p2)  }
   0xb   : > { %405 = vmatpush1.bf16.msra.mxu0 (!%p163_p2), %v946_v4  ;;  %vm207_vm2 = vcmp.eq.s32.totalorder (!%p163_p2), %v1072_v7, 15  ;;  %v977_v29 = vld [vmem:[%s1260_s2 + $0x40] sm:$0xff] (!%p163_p2)   ;;  %v979_v31 = vld [vmem:[%s1260_s2 + $0x48] sm:$0xff] (!%p163_p2)   ;;  %v962_v35 = vld [vmem:[%s1259_s1 + $0x74] ss:$8 sps:$4 sm:$0xff] (!%p163_p2)   ;;  %vm204_vm4 = vcmp.eq.s32.totalorder (!%p163_p2), %v1060_v5, 0 }
   0xc   : > { %406 = vmatprep.subr.bf16.mxu0 (!%p163_p2), %v947_v6  ;;  %v978_v30 = vld [vmem:[%s1260_s2] sm:$0xff] (!%p163_p2)   ;;  %873 = vmatprep.subr.bf16.mxu1 (!%p163_p2), %v977_v29  ;;  %v980_v32 = vld [vmem:[%s1260_s2 + $0x8] sm:$0xff] (!%p163_p2)   ;;  %v964_v36 = vld [vmem:[%s1259_s1 + $0x70] ss:$8 sps:$4 sm:$0xff] (!%p163_p2)   ;;  %v1010_v63 = vmov (!%p163_p2), 0.0   ;;  %v271_v0 = vsub.s32 (!%p163_p2), 0, %v1060_v5 }
   0xd   : > { %s1264_s16 = smov (!%p188_p3, %s802_s16), 1  ;;  %874 = vmatpush3.bf16.msra.mxu1 %v978_v30  ;;  %v961_v34 = vld [vmem:[%s1259_s1 + $0x60] ss:$8 sps:$4 sm:$0xff]   ;;  %v983_v38 = vld [vmem:[%s1260_s2 + $0x58] sm:$0xff]   ;;  %v965_v39 = vld [vmem:[%s1259_s1 + $0x84] ss:$8 sps:$4 sm:$0xff]  }
   0xe   : > { %s871_s25 = sshll.u32 %s1264_s16, 4  ;;  %875 = vmatprep.subr.bf16.mxu1 %v979_v31  ;;  %v984_v40 = vld [vmem:[%s1260_s2 + $0x18] sm:$0xff]   ;;  %v985_v41 = vld [vmem:[%s1260_s2 + $0x60] sm:$0xff]   ;;  %v987_v45 = vld [vmem:[%s1260_s2 + $0x68] sm:$0xff]   ;;  %vm1011_vm6 = vmmov 1   ;;  %vm1012_vm8 = vmmov 0  }
   0xf   : > { %s192_s30 = scalar_lea.vmem %s1258_s0, %s871_s25  ;;  %407 = vmatpush1.bf16.msra.mxu0 %v949_v14  ;;  %v967_v42 = vld [vmem:[%s1259_s1 + $0x80] ss:$8 sps:$4 sm:$0xff]   ;;  %v968_v43 = vld [vmem:[%s1259_s1 + $0x94] ss:$8 sps:$4 sm:$0xff]   ;;  %v970_v46 = vld [vmem:[%s1259_s1 + $0x90] ss:$8 sps:$4 sm:$0xff]   ;;  %s197_s6 = scalar_lea.vmem %s1262_s4, %s871_s25 }
  0x10   : > { %v199_v8 = vld [vmem:[%s192_s30] sm:$0xff]  ;;  %v200_v9 = vld [vmem:[%s192_s30 + $0x8] sm:$0xff]  ;;  %408 = vmatprep.subr.bf16.mxu0 %v950_v16  ;;  %v974_v49 = vld [vmem:[%s1259_s1 + $0xb4] ss:$8 sps:$4 sm:$0xff]  }
  0x11   : > { %v209_v10 = vrot.slane %v200_v9, 7  ;;  %v220_v11 = vrot.slane %v200_v9, 1  ;;  %v936_v12 = vpack.i.bf16 %v200_v9, %v199_v8  ;;  %v208_v13 = vrot.slane %v199_v8, 7  ;;  %876 = vmatpush3.bf16.msra.mxu1 %v980_v32  ;;  %v986_v44 = vld [vmem:[%s1260_s2 + $0x20] sm:$0xff]   ;;  %v976_v50 = vld [vmem:[%s1259_s1 + $0xb0] ss:$8 sps:$4 sm:$0xff]   ;;  %vm861_vm5 = vmneg %vm204_vm4 }
  0x12   : > { %v219_v15 = vrot.slane %v199_v8, 1  ;;  %877 = vmatprep.subr.bf16.mxu1 %v981_v33  ;;  %v971_v47 = vld [vmem:[%s1259_s1 + $0xa4] ss:$8 sps:$4 sm:$0xff]   ;;  %v973_v48 = vld [vmem:[%s1259_s1 + $0xa0] ss:$8 sps:$4 sm:$0xff]   ;;  %v989_v59 = vld [vmem:[%s1260_s2 + $0x70] sm:$0xff]  }
  0x13   : > { %937 = vrot.lane.b32.xlu0 %v936_v12, %s1009_s9  ;;  %v1085_v17 = vsel %vm210_vm0, %v208_v13, %v209_v10  ;;  %v1089_v18 = vsel %vm210_vm0, %v209_v10, %v208_v13  ;;  %409 = vmatpush1.bf16.msra.mxu0 %v952_v21  ;;  %v988_v58 = vld [vmem:[%s1260_s2 + $0x28] sm:$0xff]   ;;  %v990_v60 = vld [vmem:[%s1260_s2 + $0x30] sm:$0xff]   ;;  %v991_v61 = vld [vmem:[%s1260_s2 + $0x78] sm:$0xff]  }
  0x14   : > { %v222_v19 = vsel %vm221_vm1, %v219_v15, %v220_v11  ;;  %v223_v20 = vsel %vm221_vm1, %v220_v11, %v219_v15  ;;  %410 = vmatprep.subr.bf16.mxu0 %v953_v23  ;;  %v217_v52 = vsel %vm204_vm4, 0.0, %v1089_v18  ;;  %v992_v62 = vld [vmem:[%s1260_s2 + $0x38] sm:$0xff]   ;;  %v267_v1 = vld [vmem:[%s1261_s3] ss:$2 sm:$0x3]  ;;  %vm862_vm7 = vmpackc.low %vm1011_vm6, %vm861_vm5 }
  0x15   : > { %v229_v22 = vsel %vm207_vm2, 0.0, %v223_v20  ;;  %878 = vmatpush3.bf16.msra.mxu1 %v982_v37  ;;  %v272_v2 = vrot.slane %v267_v1, %v271_v0  ;;  %v998_v29 = vld [vmem:[%s1260_s2 + $0xa8] sm:$0xff]   ;;  %v999_v30 = vld [vmem:[%s1260_s2 + $0xb0] sm:$0xff]   ;;  %v1000_v31 = vld [vmem:[%s1260_s2 + $0xb8] sm:$0xff]  }
  0x16   : > { %v242_v24 = vpack.c.bf16 %v229_v22, %v222_v19  ;;  %879 = vmatprep.subr.bf16.mxu1 %v983_v38  ;;  %v993_v22 = vld [vmem:[%s1260_s2 + $0x80] sm:$0xff]   ;;  %vm865_vm9 = vmneg %vm207_vm2  ;;  %v275_v38 = vsub.s32 1, %v1060_v5 }
  0x17   : > { %411 = vmatpush1.bf16.msra.mxu0 %v955_v25  ;;  %v994_v25 = vld [vmem:[%s1260_s2 + $0x88] sm:$0xff]   ;;  %vm866_vm10 = vmpackc.low %vm865_vm9, %vm1011_vm6 }
  0x18   : > { %835 = vmatprep.mubr.msk.bf16.mxu0 %vm238_vm3, %v242_v24  ;;  %412 = vmatprep.subr.bf16.mxu0 %v956_v26  ;;  %v995_v26 = vld [vmem:[%s1260_s2 + $0x90] sm:$0xff]   ;;  %v276_v7 = vrot.slane %v267_v1, %v275_v38 }
  0x19   : > { %880 = vmatpush3.bf16.msra.mxu1 %v984_v40 }
  0x1a   : > { %881 = vmatprep.subr.bf16.mxu1 %v985_v41 }
  0x1b   : > { %413 = vmatpush1.bf16.msra.mxu0 %v958_v27  ;;  %v996_v27 = vld [vmem:[%s1260_s2 + $0x98] sm:$0xff]  }
  0x1c   : > { %414 = vmatprep.subr.bf16.mxu0 %v959_v28  ;;  %v997_v28 = vld [vmem:[%s1260_s2 + $0xa0] sm:$0xff]  }
  0x1d   : > { %882 = vmatpush3.bf16.msra.mxu1 %v986_v44 }
  0x1e   : > { %883 = vmatprep.subr.bf16.mxu1 %v987_v45 }
  0x1f   : > { %415 = vmatpush1.bf16.msra.mxu0 %v961_v34 }
  0x20   : > { %416 = vmatprep.subr.bf16.mxu0 %v962_v35 }
  0x21   : > { %884 = vmatpush3.bf16.msra.mxu1 %v988_v58 }
  0x22   : > { %885 = vmatprep.subr.bf16.mxu1 %v989_v59 }
  0x23   : > { %417 = vmatpush1.bf16.msra.mxu0 %v964_v36 }
  0x24   : > { %418 = vmatprep.subr.bf16.mxu0 %v965_v39  ;;  %v836_v39 = vld [vmem:[%s1261_s3 + $0x1] ss:$0 sm:$0xff] }
  0x25   : > { %886 = vmatpush3.bf16.msra.mxu1 %v990_v60 }
  0x26   : > { %887 = vmatprep.subr.bf16.mxu1 %v991_v61 }
  0x27   : > { %419 = vmatpush1.bf16.msra.mxu0 %v967_v42 }
  0x28   : > { %420 = vmatprep.subr.bf16.mxu0 %v968_v43 }
  0x29   : > { %888 = vmatpush3.bf16.msra.mxu1 %v992_v62 }
  0x2a   : > { %904 = vmatprep.subr.bf16.mxu1 %v1010_v63 }
  0x2b   : > { %421 = vmatpush1.bf16.msra.mxu0 %v970_v46 }
  0x2c   : > { %422 = vmatprep.subr.bf16.mxu0 %v971_v47 }
  0x2f   : > { %423 = vmatpush1.bf16.msra.mxu0 %v973_v48 }
  0x30   : > { %424 = vmatprep.subr.bf16.mxu0 %v974_v49 }
  0x33   : > { %425 = vmatpush1.bf16.msra.mxu0 %v976_v50 }
  0x85   : > { %v938_v51 = vpop.permute.xlu0 %937 }
  0x86   : > { %v940_v53 = vunpack.i.h.bf16 %v938_v51  ;;  %v939_v54 = vunpack.i.l.bf16 %v938_v51 }
  0x88   : > { %v239_v55 = vsel %vm238_vm3, %v217_v52, %v939_v54  ;;  %v240_v56 = vsel %vm238_vm3, %v1085_v17, %v940_v53 }
  0x89   : > { %v241_v57 = vpack.c.bf16 %v240_v56, %v239_v55 }
  0x8b   : > { %435 = vmatmul.mubr.bf16.vlgmr.msra.gmra.mrb[0].mxu0 %v241_v57 }
 0x15e   : > { %v436_v3 = vpop.f32.mrb[0].mxu0 }
 0x15f   : > { %v437_v4 = vadd.f32 %v436_v3, %v272_v2  ;;  %v438_v6 = vpop.f32.mrb[1].mxu0 }
 0x160   : > { %v440_v8 = vpop.f32.mrb[2].mxu0  ;;  %v439_v42 = vadd.f32 %v438_v6, %v276_v7 }
 0x161   : > { %v445_v9 = vmax.f32 %v437_v4, 0.0  ;;  %v441_v10 = vadd.f32 %v440_v8, %v272_v2  ;;  %v442_v11 = vpop.f32.mrb[3].mxu0 }
 0x162   : > { %v443_v47 = vadd.f32 %v442_v11, %v276_v7 }
 0x163   : > { %v446_v12 = vmax.f32 %v441_v10, 0.0  ;;  %v447_v13 = vrot.slane %v445_v9, 7  ;;  %v453_v14 = vrot.slane %v445_v9, 1 }
 0x165   : > { %v448_v15 = vrot.slane %v446_v12, 7  ;;  %v454_v16 = vrot.slane %v446_v12, 1  ;;  %v460_v17 = vpack.c.bf16 %v446_v12, %v445_v9 }
 0x167   : > { %v455_v18 = vsel %vm221_vm1, %v453_v14, %v454_v16  ;;  %v456_v19 = vsel %vm221_vm1, %v454_v16, %v453_v14  ;;  %691 = vmatprep.mubr.bf16.mxu1 %v460_v17  ;;  %v449_v20 = vsel %vm210_vm0, %v447_v13, %v448_v15  ;;  %v450_v21 = vsel %vm210_vm0, %v448_v15, %v447_v13 }
 0x168   : > { %v867_v23 = vpack.c.bf16 %v456_v19, %v455_v18  ;;  %v863_v24 = vpack.c.bf16 %v449_v20, %v450_v21 }
 0x16a   : > { %864 = vmatmul.mubr.msk.bf16.vlgmr.msra.gmra.mrb[0].mxu1 %vm862_vm7, %v863_v24 }
 0x16b   : > { %905 = vmatpush3.bf16.msra.mxu1 %v993_v22  ;;  %920 = vmatprep.mubr.msk.bf16.mxu1 %vm1012_vm8, %v1010_v63 }
 0x16c   : > { %906 = vmatprep.subr.bf16.mxu1 %v1010_v63 }
 0x16f   : > { %907 = vmatpush3.bf16.msra.mxu1 %v994_v25 }
 0x170   : > { %908 = vmatprep.subr.bf16.mxu1 %v1010_v63 }
 0x173   : > { %909 = vmatpush3.bf16.msra.mxu1 %v995_v26 }
 0x174   : > { %910 = vmatprep.subr.bf16.mxu1 %v1010_v63 }
 0x177   : > { %911 = vmatpush3.bf16.msra.mxu1 %v996_v27 }
 0x178   : > { %912 = vmatprep.subr.bf16.mxu1 %v1010_v63 }
 0x17b   : > { %913 = vmatpush3.bf16.msra.mxu1 %v997_v28 }
 0x17c   : > { %914 = vmatprep.subr.bf16.mxu1 %v1010_v63 }
 0x17f   : > { %915 = vmatpush3.bf16.msra.mxu1 %v998_v29 }
 0x180   : > { %916 = vmatprep.subr.bf16.mxu1 %v1010_v63 }
 0x183   : > { %917 = vmatpush3.bf16.msra.mxu1 %v999_v30 }
 0x184   : > { %918 = vmatprep.subr.bf16.mxu1 %v1010_v63 }
 0x187   : > { %919 = vmatpush3.bf16.msra.mxu1 %v1000_v31 }
 0x18a   : > { %921 = vmatmul.mubr.msk.bf16.vlgmr.msra.gmra.mrb[4].mxu1 %vm866_vm10, %v867_v23 }
 0x23d   : > { %v889_v32 = vpop.f32.mrb[0].mxu1 }
 0x23e   : > { %v890_v33 = vpop.f32.mrb[1].mxu1 }
 0x23f   : > { %v891_v34 = vadd.f32 %v890_v33, %v889_v32  ;;  %v892_v35 = vpop.f32.mrb[2].mxu1 }
 0x240   : > { %v893_v36 = vpop.f32.mrb[3].mxu1 }
 0x241   : > { %v894_v37 = vadd.f32 %v893_v36, %v892_v35  ;;  %v694_v40 = vadd.f32 %v891_v34, %v836_v39 }
 0x243   : > { %v697_v45 = vadd.f32 %v894_v37, %v836_v39 }
 0x25d   : > { %v734_v41 = vpop.f32.mrb[4].mxu1 }
 0x25e   : > { %v735_v43 = vadd.f32 %v734_v41, %v694_v40  ;;  %v922_v44 = vpop.f32.mrb[5].mxu1 }
 0x25f   : > { %v737_v46 = vpop.f32.mrb[6].mxu1 }
 0x260   : > { %v741_v48 = vadd.f32 %v735_v43, %v439_v42  ;;  %v738_v49 = vadd.f32 %v737_v46, %v697_v45  ;;  %v923_v50 = vpop.f32.mrb[7].mxu1 }
 0x262   : > { %v743_v5 = vmax.f32 %v741_v48, 0.0  ;;  %v742_v51 = vadd.f32 %v738_v49, %v443_v47 }
 0x264   : > { %745 = vst [vmem:[%s197_s6] sm:$0xff] %v743_v5  ;;  %v744_v52 = vmax.f32 %v742_v51, 0.0 }
 0x266   : > { %746 = vst [vmem:[%s197_s6 + $0x8] sm:$0xff] %v744_v52 }
 0x267 PF: > { %s14_s15 = sadd.s32 1, %s1007_s15  }
 0x268   : > { %p11_p4 = scmp.ge.s32.totalorder %s14_s15, 4  }
 0x26a   :  { %13 = sbr.rel (!%p11_p4) target bundleno = 1 (0x1), region = 66 }

</bundles_post_ra>
